<compile_context>
chip_gen: v7x
topology: tpu7x:2x2x1
jax: 0.10.0
libtpu: 0.0.40
codegen_flags: <defaults>
</compile_context>

<pallas_src>
import jax
import jax.numpy as jnp
from jax.experimental import pallas as pl
from jax.experimental.pallas import tpu as pltpu

_LANES = 128
# Dense path: 4096 rows x 128 lanes x 4 B = 2 MiB (f32) per input per grid step.
_DENSE_BLK_ROWS = 4096
# Fallback (2, B) path: 2 x 65536 x 4 B = 512 KiB logical per input per step
# (2 MiB VMEM per buffer after 2 -> 8 sublane padding; 8 MiB total pipelined).
_FALLBACK_BLK_COLS = 65536


def _make_kernel(block_extent, total_extent, grid_axis):
    """Per-block partial sum of (a - 1)^2 + b^2, accumulated in f32."""
    need_mask = (total_extent % block_extent) != 0  # static Python bool

    def kernel(a_ref, b_ref, o_ref):
        a = a_ref[...].astype(jnp.float32)
        b = b_ref[...].astype(jnp.float32)
        d = a - 1.0
        term = d * d + b * b
        if need_mask:
            # Only the last grid step reads past the array end; zero those
            # elements (where() selects, so OOB garbage/NaN never propagates).
            idx = jax.lax.broadcasted_iota(jnp.int32, term.shape, grid_axis)
            valid = (pl.program_id(0) * block_extent + idx) < total_extent
            term = jnp.where(valid, term, 0.0)
        # One cross-lane reduce per independent block; no cross-step RMW chain.
        o_ref[0, 0] = jnp.sum(term)

    return kernel


def loss_ab(a, b):
    """a, b indexable as a[0], a[1] of shape (B, 1).

    Returns the scalar  sum((a[0]-1)^2 + b[0]^2 + (a[1]-1)^2 + b[1]^2).
    """
    a = jnp.asarray(a)
    b = jnp.asarray(b)
    assert a.shape == b.shape, "a and b must have the same shape"
    assert a.shape[0] == 2, "expected a[0], a[1] (leading dim of size 2)"

    n = a.size
    if n % _LANES == 0:
        # Lane- and sublane-dense view (free reshape of a contiguous array —
        # no pad, no extra HBM traffic).
        rows = n // _LANES
        a2 = a.reshape(rows, _LANES)
        b2 = b.reshape(rows, _LANES)
        blk = min(rows, _DENSE_BLK_ROWS)
        grid = (pl.cdiv(rows, blk),)
        block_shape = (blk, _LANES)
        index_map = lambda i: (i, 0)
        kernel = _make_kernel(blk, rows, grid_axis=0)
    else:
        # Ragged sizes: keep the natural (2, B) view (also a free reshape) and
        # mask the tail in-kernel — never materialize a padded copy in HBM.
        a2 = a.reshape(2, -1)
        b2 = b.reshape(2, -1)
        cols = a2.shape[1]
        blk = min(cols, _FALLBACK_BLK_COLS)
        grid = (pl.cdiv(cols, blk),)
        block_shape = (2, blk)
        index_map = lambda i: (0, i)
        kernel = _make_kernel(blk, cols, grid_axis=1)

    num_blocks = grid[0]

    partials = pl.pallas_call(
        kernel,
        out_shape=jax.ShapeDtypeStruct((num_blocks, 1), jnp.float32),
        grid=grid,
        in_specs=[
            pl.BlockSpec(block_shape, index_map),
            pl.BlockSpec(block_shape, index_map),
        ],
        out_specs=pl.BlockSpec(
            (1, 1), lambda i: (i, 0), memory_space=pltpu.MemorySpace.SMEM
        ),
        compiler_params=pltpu.CompilerParams(
            # Independent per-block partial sums -> parallel grid axis.
            dimension_semantics=("parallel",)
        ),
    )(a2, b2)

    # Tiny final reduce over per-block partials (scalar for the common case).
    return jnp.sum(partials)


def _reference(a, b):
    """Pure-JAX mirror of the PyTorch module (for sanity checking)."""
    a = jnp.asarray(a, jnp.float32)
    b = jnp.asarray(b, jnp.float32)
    ones = jnp.ones_like(a[0])
    lab = (a[0] - ones) ** 2 + b[0] ** 2 + (a[1] - ones) ** 2 + b[1] ** 2
    return jnp.sum(lab)


if __name__ == "__main__":
    key = jax.random.PRNGKey(0)
    k1, k2 = jax.random.split(key)

    # LossAB.forward(a, b): a[j], b[j] have shape (batch_size, 1), j in {0, 1}.
    batch_size = 8
    a = jax.random.normal(k1, (2, batch_size, 1), dtype=jnp.float32)
    b = jax.random.normal(k2, (2, batch_size, 1), dtype=jnp.float32)

    out = jax.block_until_ready(loss_ab(a, b))
    ref = _reference(a, b)
    assert out.shape == (), f"expected scalar, got {out.shape}"
    assert jnp.allclose(out, ref, atol=1e-5, rtol=1e-5), (out, ref)

    # Also exercise the lane-dense path (total elements divisible by 128).
    batch_size2 = 512
    a2 = jax.random.normal(k1, (2, batch_size2, 1), dtype=jnp.float32)
    b2 = jax.random.normal(k2, (2, batch_size2, 1), dtype=jnp.float32)
    out2 = jax.block_until_ready(loss_ab(a2, b2))
    ref2 = _reference(a2, b2)
    assert jnp.allclose(out2, ref2, atol=1e-4, rtol=1e-5), (out2, ref2)

    print("KERNEL_OK")
</pallas_src>

<mosaic_0001>
module attributes {stable_mosaic.version = 11 : i64} {
  func.func @kernel(%arg0: i32, %arg1: memref<2x8xf32, #tpu.memory_space<vmem>>, %arg2: memref<2x8xf32, #tpu.memory_space<vmem>>, %arg3: memref<1x1xf32, #tpu.memory_space<smem>>) attributes {dimension_semantics = [#tpu.dimension_semantics<parallel>], iteration_bounds = array<i64: 1>, scalar_prefetch = 0 : i64, scratch_operands = 0 : i64, tpu.core_type = #tpu.core_type<tc>, window_params = [{transform_indices = @transform_0, window_bounds = array<i64: 2, 8>}, {transform_indices = @transform_1, window_bounds = array<i64: 2, 8>}, {transform_indices = @transform_2, window_bounds = array<i64: 1, 1>}]} {
    %c0 = arith.constant 0 : index
    %c0_0 = arith.constant 0 : index
    %0 = vector.load %arg1[%c0, %c0_0] : memref<2x8xf32, #tpu.memory_space<vmem>>, vector<2x8xf32>
    %c0_1 = arith.constant 0 : index
    %c0_2 = arith.constant 0 : index
    %1 = vector.load %arg2[%c0_1, %c0_2] : memref<2x8xf32, #tpu.memory_space<vmem>>, vector<2x8xf32>
    %cst = arith.constant 1.000000e+00 : f32
    %2 = vector.broadcast %cst : f32 to vector<2x8xf32>
    %3 = arith.subf %0, %2 : vector<2x8xf32>
    %4 = arith.mulf %3, %3 : vector<2x8xf32>
    %5 = arith.mulf %1, %1 : vector<2x8xf32>
    %6 = arith.addf %4, %5 : vector<2x8xf32>
    %7 = vector.shape_cast %6 : vector<2x8xf32> to vector<1x2x8xf32>
    %cst_3 = arith.constant dense<0.000000e+00> : vector<1xf32>
    %8 = vector.multi_reduction <add>, %7, %cst_3 [1, 2] : vector<1x2x8xf32> to vector<1xf32>
    %9 = vector.shape_cast %8 : vector<1xf32> to vector<1x1x1xf32>
    %10 = vector.extract %9[0, 0, 0] : f32 from vector<1x1x1xf32>
    %c0_4 = arith.constant 0 : index
    %c0_5 = arith.constant 0 : index
    %11 = memref.load %arg3[%c0_4, %c0_5] : memref<1x1xf32, #tpu.memory_space<smem>>
    memref.store %10, %arg3[%c0_4, %c0_5] : memref<1x1xf32, #tpu.memory_space<smem>>
    return
  }
  func.func @transform_0(%arg0: i32) -> (i32, i32) {
    %c0_i32 = arith.constant 0 : i32
    %c0_i32_0 = arith.constant 0 : i32
    return %c0_i32, %arg0 : i32, i32
  }
  func.func @transform_1(%arg0: i32) -> (i32, i32) {
    %c0_i32 = arith.constant 0 : i32
    %c0_i32_0 = arith.constant 0 : i32
    return %c0_i32, %arg0 : i32, i32
  }
  func.func @transform_2(%arg0: i32) -> (i32, i32) {
    %c0_i32 = arith.constant 0 : i32
    %c0_i32_0 = arith.constant 0 : i32
    return %arg0, %c0_i32 : i32, i32
  }
}

</mosaic_0001>

<bundles_post_ra>
// kernel: tpu_custom_call.1
= control target key start
LH: loop header
LB: loop body
LE: loop exit
PB: predicated region body
PF: predicated region fallthrough
CT: control target
= control target key end

     0   :  { %7 = vsyncpa [#allocation3], 0  ;;  %s142_s0 = inlined_call_operand.hbm [shape: f32[2,8], index: 0, kind: input, shape index: {}]   ;;  %s143_s1 = inlined_call_operand.vmem [shape: f32[2,8], index: 1, kind: input, shape index: {}]   ;;  %s144_s2 = inlined_call_operand.hbm [shape: f32[1,1], index: 2, kind: output, shape index: {}]  }
   0x1   :  { %8 = vsyncpa [#allocation4], 0  ;;  %s98_s9 = smov [#allocation2]   ;;  %s62_s13 = scalar_lea.hbm %s142_s0, 32 }
   0x2   :  { %s15_s10 = sshll.u32 %s98_s9, 4  ;;  %p63_p0 = scmp.ne.s32.totalorder %s142_s0, %s62_s13  ;;  %s16_s10 = int_to_ptr.vmem [resolvable:$true] %s15_s10 }
   0x3   :  { %p66_p1 = scmp.lt.u32.totalorder %s62_s13, %s142_s0 }
   0x5   :  { %p68_p2 = pnand %p66_p1, %p63_p0 }
   0x7   :  { %71 = shalt.err (!%p68_p2)
}
   0x8   :  { %s72_s18 = scalar_lea.vmem %s16_s10, 32  ;;  %p77_p4 = scmp.lt.s32.totalorder %s16_s10, %s16_s10 }
   0x9   :  { %p73_p3 = scmp.ne.s32.totalorder %s16_s10, %s72_s18  ;;  %p78_p5 = scmp.lt.s32.totalorder %s72_s18, %s72_s18 }
   0xb   :  { %p79_p6 = por %p78_p5, %p77_p4 }
   0xd   :  { %p80_p7 = pnand %p79_p6, %p73_p3 }
   0xf   :  { %83 = shalt.err (!%p80_p7)
}
  0x10   :  { %18 = dma.hbm_to_vmem [thread:$0]  %s142_s0, 32, %s16_s10, [#allocation3]  }
  0x11   :  { %94 = dma.done.wait [#allocation3], 32  }
  0x12   :  { %95 = vsyncadd [#allocation3], 4294967264  ;;  %v24_v0 = vld [vmem:[#allocation2] sm:$0x3]  ;;  %vm30_vm0 = vcmask 58368  }
  0x13   :  { %v25_v1 = vld [vmem:[%s143_s1] sm:$0x3]  ;;  %v57_v2 = vadd.f32 -1.0, %v24_v0  ;;  %s84_s1 = scalar_lea.hbm %s144_s2, 16 }
  0x14   :  { %v28_v3 = vmul.f32 %v25_v1, %v25_v1  ;;  %p85_p8 = scmp.ne.s32.totalorder %s144_s2, %s84_s1  ;;  %p88_p9 = scmp.lt.u32.totalorder %s84_s1, %s144_s2 }
  0x15   :  { %v27_v4 = vmul.f32 %v57_v2, %v57_v2 }
  0x16   :  { %p90_p10 = pnand %p88_p9, %p85_p8 }
  0x17   :  { %v29_v5 = vadd.f32 %v28_v3, %v27_v4 }
  0x19   :  { %v31_v6 = vsel %vm30_vm0, %v29_v5, 0.0 }
  0x1a   :  { %32 = vadd.xlane.f32.xlu0 %v31_v6 }
  0xa7   :  { %v33_v7 = vpop.xlane.xlu0 %32 }
  0xa8   :  { %v34_v8 = vrot.slane %v33_v7, 4 }
  0xaa   :  { %v35_v9 = vadd.f32 %v34_v8, %v33_v7 }
  0xac   :  { %v36_v10 = vrot.slane %v35_v9, 2 }
  0xae   :  { %v37_v11 = vadd.f32 %v36_v10, %v35_v9 }
  0xb0   :  { %v38_v12 = vrot.slane %v37_v11, 1 }
  0xb2   :  { %v39_v13 = vadd.f32 %v38_v12, %v37_v11 }
  0xb4   :  { %58 = vpush %v39_v13 }
  0xe5   :  { %s59_s0 = spop %58 }
  0xe6   :  { %42 = sst [smem:[#allocation5]] %s59_s0 }
  0xe7   :  { %93 = shalt.err (!%p90_p10)
}
  0xe8   :  { %s99_s29 = smov [#allocation5]  }
  0xe9   :  { %50 = dma.smem_to_hbm %s99_s29, 16, %s144_s2, [#allocation4]  }
  0xea   :  { %96 = dma.done.wait [#allocation4], 16  }
  0xeb   :  { %97 = vsyncadd [#allocation4], 4294967280 }
  0xec   :  { %54 = sfence }
  0xed   :  { %55 = vsyncpa [#allocation3], 1 }
  0xee   :  { %56 = vsyncpa [#allocation4], 1 }

</bundles_post_ra>
